<compile_context>
chip_gen: v5e
topology: v5e:2x2
jax: 0.10.0
libtpu: 0.0.40
codegen_flags: <defaults>
</compile_context>

<pallas_src>
import functools

import jax
import jax.numpy as jnp
from jax import lax
from jax.experimental import pallas as pl
from jax.experimental.pallas import tpu as pltpu


def _round_up(n, m):
    return ((n + m - 1) // m) * m


def _pad_to(a, shape):
    pads = [(0, s - d) for d, s in zip(a.shape, shape)]
    return jnp.pad(a, pads)


def deepnet_kernel(x_ref, w1_ref, b1_ref, w2_ref, b2_ref, w3_ref, b3_ref,
                   o_ref, *, num_layers, unroll):
    """One batch tile fully in VMEM: bf16 matmuls on the MXU (f32 accumulate),
    bias + ReLU in f32 on the VPU."""
    # fc1 + relu  (x and w1 are already bf16; accumulate in f32)
    h = jnp.dot(x_ref[...], w1_ref[...], preferred_element_type=jnp.float32)
    h = jnp.maximum(h + b1_ref[...], 0.0)

    # (num_layers - 2) repetitions of fc2 + relu (shared weights, as in the PyTorch module).
    # Read w2/b2 from their VMEM refs inside the loop: a (1, H_P) broadcast-add is nearly
    # free on the VPU, and not holding a (TB, H_P) broadcast / (H_P, H_P) value live across
    # the unrolled loop avoids vreg spills that steal vld/vst slots from the MXU feed.
    def hidden_layer(_, h):
        z = jnp.dot(h.astype(jnp.bfloat16), w2_ref[...],
                    preferred_element_type=jnp.float32)
        return jnp.maximum(z + b2_ref[...], 0.0)

    h = lax.fori_loop(0, num_layers - 2, hidden_layer, h, unroll=unroll)

    # fc3 (no activation)
    out = jnp.dot(h.astype(jnp.bfloat16), w3_ref[...],
                  preferred_element_type=jnp.float32) + b3_ref[...]
    o_ref[...] = out.astype(o_ref.dtype)


def prepare_params(params):
    """Pad to lane-dense (multiple-of-128) shapes and cast matmul operands to bf16 ONCE.
    Call at param-load time; doing this per forward would re-stream every parameter
    through HBM on each call."""
    w1, b1, w2, b2, w3, b3 = params
    input_size, hidden_size = w1.shape
    IN_P = _round_up(input_size, 128)
    H_P = _round_up(hidden_size, 128)
    return {
        "input_size": int(input_size),
        "hidden_size": int(hidden_size),
        "w1": _pad_to(w1, (IN_P, H_P)).astype(jnp.bfloat16),
        "b1": _pad_to(jnp.reshape(b1, (1, -1)), (1, H_P)).astype(jnp.float32),
        "w2": _pad_to(w2, (H_P, H_P)).astype(jnp.bfloat16),
        "b2": _pad_to(jnp.reshape(b2, (1, -1)), (1, H_P)).astype(jnp.float32),
        "w3": _pad_to(w3, (H_P, IN_P)).astype(jnp.bfloat16),
        "b3": _pad_to(jnp.reshape(b3, (1, -1)), (1, IN_P)).astype(jnp.float32),
    }


def _choose_batch_tiling(B, batch_tile):
    """Pick (tile_rows, padded_batch, num_tiles).

    * tiny batch (< 32 rows): a single round_up(B, 16)-row tile -- don't stream ~120
      all-zero rows through every matmul of every layer.
    * medium batch: split into 2 tiles so the 'parallel' grid axis actually spans both
      TensorCores on v7x megacore (weights live in each TC's own VMEM, so this is free).
    * large batch: batch_tile-row tiles (256 amortizes the 256-wide MXU fill/drain and the
      ~0.35us per-grid-step overhead on v6e/v7x; use batch_tile=128 on v5e).
    """
    B16 = _round_up(B, 16)
    if B16 < 32:
        tb = B16
    elif B16 < 2 * batch_tile:
        tb = _round_up(B16 // 2, 16)
    else:
        tb = batch_tile
    b_p = _round_up(B16, tb)
    return tb, b_p, b_p // tb


def deepnet_forward(x, prepared, num_layers, *, batch_tile=256, out_dtype=jnp.float32):
    """Whole MLP per batch tile with VMEM-resident, single-buffered weights; padding sliced
    off at the end. Zero padding is exact: padded W columns/rows and bias lanes are zero, so
    padded hidden lanes stay zero through ReLU and contribute nothing downstream."""
    B, input_size = x.shape
    assert input_size == prepared["input_size"]
    hidden_size = prepared["hidden_size"]

    IN_P = _round_up(input_size, 128)
    H_P = _round_up(hidden_size, 128)
    TB, B_P, num_tiles = _choose_batch_tiling(B, batch_tile)

    # Only the activation tile is padded/cast per call (cheap vs. the weights).
    xp = _pad_to(x, (B_P, IN_P)).astype(jnp.bfloat16)

    n_hidden = num_layers - 2
    # Cap unrolling: fully unrolling deep nets blows up code size / live ranges (spills).
    unroll = max(1, min(n_hidden, 4))
    kernel = functools.partial(deepnet_kernel, num_layers=num_layers, unroll=unroll)

    # Weights/biases: constant block index -> resident in VMEM across all batch tiles.
    # Single-buffered: default double-buffering would pointlessly double resident VMEM
    # (matters on v7x's 64 MiB/TC and under v5e's 16 MiB default scoped limit).
    def const_spec(shape):
        return pl.BlockSpec(shape, lambda i: (0, 0), pipeline_mode=pl.Buffered(1))

    out_itemsize = jnp.dtype(out_dtype).itemsize
    weight_bytes = ((IN_P * H_P + H_P * H_P + H_P * IN_P) * 2   # bf16 weights (1 buffer each)
                    + (2 * H_P + IN_P) * 4)                     # f32 biases
    io_bytes = 2 * TB * IN_P * 2 + 2 * TB * IN_P * out_itemsize  # x / out tiles, double-buffered
    headroom = max(4 << 20, 4 * TB * H_P * 4)                    # f32 activations + scratch
    vmem_limit = min(max(weight_bytes + io_bytes + headroom, 32 << 20), 128 << 20)
    # TODO(synk): when the bf16 weight set exceeds ~45 MiB (v7x has 64 MiB VMEM/TC), stream
    # W2 (and W1/W3) in (H_P, tn) column blocks via an extra grid axis / pltpu.emit_pipeline
    # instead of keeping everything VMEM-resident.

    flops = 2 * B_P * (IN_P * H_P + n_hidden * H_P * H_P + H_P * IN_P)
    bytes_accessed = B_P * IN_P * 2 + weight_bytes + B_P * IN_P * out_itemsize

    out_p = pl.pallas_call(
        kernel,
        out_shape=jax.ShapeDtypeStruct((B_P, IN_P), out_dtype),
        grid_spec=pl.GridSpec(
            grid=(num_tiles,),
            in_specs=[
                pl.BlockSpec((TB, IN_P), lambda i: (i, 0)),   # x batch tile (double-buffered)
                const_spec((IN_P, H_P)),                      # w1
                const_spec((1, H_P)),                         # b1
                const_spec((H_P, H_P)),                       # w2
                const_spec((1, H_P)),                         # b2
                const_spec((H_P, IN_P)),                      # w3
                const_spec((1, IN_P)),                        # b3
            ],
            out_specs=pl.BlockSpec((TB, IN_P), lambda i: (i, 0)),
        ),
        compiler_params=pltpu.CompilerParams(
            dimension_semantics=("parallel",),   # shard batch tiles across TCs (v7x megacore)
            vmem_limit_bytes=int(vmem_limit),
        ),
        cost_estimate=pl.CostEstimate(flops=int(flops), transcendentals=0,
                                      bytes_accessed=int(bytes_accessed)),
    )(xp, prepared["w1"], prepared["b1"], prepared["w2"], prepared["b2"],
      prepared["w3"], prepared["b3"])

    return out_p[:B, :input_size]


def init_params(key, input_size, hidden_size):
    """Deterministic init mimicking nn.Linear's U(-1/sqrt(fan_in), 1/sqrt(fan_in))."""
    ks = jax.random.split(key, 6)

    def lin(kw, kb, fan_in, fan_out):
        bound = 1.0 / jnp.sqrt(fan_in)
        w = jax.random.uniform(kw, (fan_in, fan_out), jnp.float32, -bound, bound)
        b = jax.random.uniform(kb, (1, fan_out), jnp.float32, -bound, bound)
        return w, b

    w1, b1 = lin(ks[0], ks[1], input_size, hidden_size)
    w2, b2 = lin(ks[2], ks[3], hidden_size, hidden_size)
    w3, b3 = lin(ks[4], ks[5], hidden_size, input_size)
    return (w1, b1, w2, b2, w3, b3)


def deepnet_ref(x, params, num_layers):
    w1, b1, w2, b2, w3, b3 = params
    h = jnp.maximum(x @ w1 + b1, 0.0)
    for _ in range(num_layers - 2):
        h = jnp.maximum(h @ w2 + b2, 0.0)
    return h @ w3 + b3


if __name__ == "__main__":
    input_size, hidden_size, num_layers = 16, 32, 4
    batch = 8

    key = jax.random.PRNGKey(0)
    kx, kp = jax.random.split(key)
    x = jax.random.normal(kx, (batch, input_size), jnp.float32)
    params = init_params(kp, input_size, hidden_size)

    # Pad/cast parameters once (amortized across all forward calls).
    prepared = prepare_params(params)

    out = deepnet_forward(x, prepared, num_layers)
    out = jax.block_until_ready(out)

    ref = deepnet_ref(x, params, num_layers)  # f32 reference
    assert out.shape == (batch, input_size)
    # bf16 matmul operands -> loosened tolerance vs. the f32 reference. Note the rounding
    # error compounds with num_layers (activations re-cast to bf16 each hidden layer).
    assert jnp.allclose(out, ref, atol=3e-2, rtol=3e-2), \
        float(jnp.max(jnp.abs(out - ref)))

    print("KERNEL_OK")
</pallas_src>

<mosaic_0001>
module attributes {stable_mosaic.version = 11 : i64} {
  func.func @deepnet_kernel(%arg0: i32, %arg1: memref<16x128xbf16, #tpu.memory_space<vmem>>, %arg2: memref<128x128xbf16, #tpu.memory_space<vmem>>, %arg3: memref<1x128xf32, #tpu.memory_space<vmem>>, %arg4: memref<128x128xbf16, #tpu.memory_space<vmem>>, %arg5: memref<1x128xf32, #tpu.memory_space<vmem>>, %arg6: memref<128x128xbf16, #tpu.memory_space<vmem>>, %arg7: memref<1x128xf32, #tpu.memory_space<vmem>>, %arg8: memref<16x128xf32, #tpu.memory_space<vmem>>) attributes {dimension_semantics = [#tpu.dimension_semantics<parallel>], iteration_bounds = array<i64: 1>, scalar_prefetch = 0 : i64, scratch_operands = 0 : i64, tpu.core_type = #tpu.core_type<tc>, window_params = [{transform_indices = @transform_0, window_bounds = array<i64: 16, 128>}, {pipeline_mode = #tpu.pipeline_mode<synchronous>, transform_indices = @transform_1, window_bounds = array<i64: 128, 128>}, {pipeline_mode = #tpu.pipeline_mode<synchronous>, transform_indices = @transform_2, window_bounds = array<i64: 1, 128>}, {pipeline_mode = #tpu.pipeline_mode<synchronous>, transform_indices = @transform_3, window_bounds = array<i64: 128, 128>}, {pipeline_mode = #tpu.pipeline_mode<synchronous>, transform_indices = @transform_4, window_bounds = array<i64: 1, 128>}, {pipeline_mode = #tpu.pipeline_mode<synchronous>, transform_indices = @transform_5, window_bounds = array<i64: 128, 128>}, {pipeline_mode = #tpu.pipeline_mode<synchronous>, transform_indices = @transform_6, window_bounds = array<i64: 1, 128>}, {transform_indices = @transform_7, window_bounds = array<i64: 16, 128>}]} {
    %c0 = arith.constant 0 : index
    %c0_0 = arith.constant 0 : index
    %0 = vector.load %arg1[%c0, %c0_0] : memref<16x128xbf16, #tpu.memory_space<vmem>>, vector<16x128xbf16>
    %c0_1 = arith.constant 0 : index
    %c0_2 = arith.constant 0 : index
    %1 = vector.load %arg2[%c0_1, %c0_2] : memref<128x128xbf16, #tpu.memory_space<vmem>>, vector<128x128xbf16>
    %cst = arith.constant dense<0.000000e+00> : vector<16x128xf32>
    %2 = tpu.matmul %0, %1, %cst {dimension_numbers = #tpu.dot_dimension_numbers<[1], [0], [0], [1], [0, 0, 1, 1], [], []>} : vector<16x128xbf16>, vector<128x128xbf16>, vector<16x128xf32> -> vector<16x128xf32>
    %c0_3 = arith.constant 0 : index
    %c0_4 = arith.constant 0 : index
    %3 = vector.load %arg3[%c0_3, %c0_4] : memref<1x128xf32, #tpu.memory_space<vmem>>, vector<1x128xf32>
    %4 = vector.broadcast %3 : vector<1x128xf32> to vector<16x128xf32>
    %5 = arith.addf %2, %4 : vector<16x128xf32>
    %cst_5 = arith.constant 0.000000e+00 : f32
    %6 = vector.broadcast %cst_5 : f32 to vector<16x128xf32>
    %7 = arith.maximumf %5, %6 : vector<16x128xf32>
    %c0_i32 = arith.constant 0 : i32
    %8 = arith.truncf %7 : vector<16x128xf32> to vector<16x128xbf16>
    %c0_6 = arith.constant 0 : index
    %c0_7 = arith.constant 0 : index
    %9 = vector.load %arg4[%c0_6, %c0_7] : memref<128x128xbf16, #tpu.memory_space<vmem>>, vector<128x128xbf16>
    %cst_8 = arith.constant dense<0.000000e+00> : vector<16x128xf32>
    %10 = tpu.matmul %8, %9, %cst_8 {dimension_numbers = #tpu.dot_dimension_numbers<[1], [0], [0], [1], [0, 0, 1, 1], [], []>} : vector<16x128xbf16>, vector<128x128xbf16>, vector<16x128xf32> -> vector<16x128xf32>
    %c0_9 = arith.constant 0 : index
    %c0_10 = arith.constant 0 : index
    %11 = vector.load %arg5[%c0_9, %c0_10] : memref<1x128xf32, #tpu.memory_space<vmem>>, vector<1x128xf32>
    %12 = vector.broadcast %11 : vector<1x128xf32> to vector<16x128xf32>
    %13 = arith.addf %10, %12 : vector<16x128xf32>
    %cst_11 = arith.constant 0.000000e+00 : f32
    %14 = vector.broadcast %cst_11 : f32 to vector<16x128xf32>
    %15 = arith.maximumf %13, %14 : vector<16x128xf32>
    %c1_i32 = arith.constant 1 : i32
    %16 = arith.truncf %15 : vector<16x128xf32> to vector<16x128xbf16>
    %c0_12 = arith.constant 0 : index
    %c0_13 = arith.constant 0 : index
    %17 = vector.load %arg4[%c0_12, %c0_13] : memref<128x128xbf16, #tpu.memory_space<vmem>>, vector<128x128xbf16>
    %cst_14 = arith.constant dense<0.000000e+00> : vector<16x128xf32>
    %18 = tpu.matmul %16, %17, %cst_14 {dimension_numbers = #tpu.dot_dimension_numbers<[1], [0], [0], [1], [0, 0, 1, 1], [], []>} : vector<16x128xbf16>, vector<128x128xbf16>, vector<16x128xf32> -> vector<16x128xf32>
    %c0_15 = arith.constant 0 : index
    %c0_16 = arith.constant 0 : index
    %19 = vector.load %arg5[%c0_15, %c0_16] : memref<1x128xf32, #tpu.memory_space<vmem>>, vector<1x128xf32>
    %20 = vector.broadcast %19 : vector<1x128xf32> to vector<16x128xf32>
    %21 = arith.addf %18, %20 : vector<16x128xf32>
    %cst_17 = arith.constant 0.000000e+00 : f32
    %22 = vector.broadcast %cst_17 : f32 to vector<16x128xf32>
    %23 = arith.maximumf %21, %22 : vector<16x128xf32>
    %24 = arith.truncf %23 : vector<16x128xf32> to vector<16x128xbf16>
    %c0_18 = arith.constant 0 : index
    %c0_19 = arith.constant 0 : index
    %25 = vector.load %arg6[%c0_18, %c0_19] : memref<128x128xbf16, #tpu.memory_space<vmem>>, vector<128x128xbf16>
    %cst_20 = arith.constant dense<0.000000e+00> : vector<16x128xf32>
    %26 = tpu.matmul %24, %25, %cst_20 {dimension_numbers = #tpu.dot_dimension_numbers<[1], [0], [0], [1], [0, 0, 1, 1], [], []>} : vector<16x128xbf16>, vector<128x128xbf16>, vector<16x128xf32> -> vector<16x128xf32>
    %c0_21 = arith.constant 0 : index
    %c0_22 = arith.constant 0 : index
    %27 = vector.load %arg7[%c0_21, %c0_22] : memref<1x128xf32, #tpu.memory_space<vmem>>, vector<1x128xf32>
    %28 = vector.broadcast %27 : vector<1x128xf32> to vector<16x128xf32>
    %29 = arith.addf %26, %28 : vector<16x128xf32>
    %c0_23 = arith.constant 0 : index
    %c0_24 = arith.constant 0 : index
    %30 = vector.load %arg8[%c0_23, %c0_24] : memref<16x128xf32, #tpu.memory_space<vmem>>, vector<16x128xf32>
    tpu.vector_store %arg8[%c0_23, %c0_24], %29 {strides = array<i32>} : memref<16x128xf32, #tpu.memory_space<vmem>>, vector<16x128xf32>,
    return
  }
  func.func @transform_0(%arg0: i32) -> (i32, i32) {
    %c0_i32 = arith.constant 0 : i32
    %c0_i32_0 = arith.constant 0 : i32
    return %arg0, %c0_i32 : i32, i32
  }
  func.func @transform_1(%arg0: i32) -> (i32, i32) {
    %c0_i32 = arith.constant 0 : i32
    %c0_i32_0 = arith.constant 0 : i32
    %c0_i32_1 = arith.constant 0 : i32
    return %c0_i32, %c0_i32_0 : i32, i32
  }
  func.func @transform_2(%arg0: i32) -> (i32, i32) {
    %c0_i32 = arith.constant 0 : i32
    %c0_i32_0 = arith.constant 0 : i32
    %c0_i32_1 = arith.constant 0 : i32
    return %c0_i32, %c0_i32_0 : i32, i32
  }
  func.func @transform_3(%arg0: i32) -> (i32, i32) {
    %c0_i32 = arith.constant 0 : i32
    %c0_i32_0 = arith.constant 0 : i32
    %c0_i32_1 = arith.constant 0 : i32
    return %c0_i32, %c0_i32_0 : i32, i32
  }
  func.func @transform_4(%arg0: i32) -> (i32, i32) {
    %c0_i32 = arith.constant 0 : i32
    %c0_i32_0 = arith.constant 0 : i32
    %c0_i32_1 = arith.constant 0 : i32
    return %c0_i32, %c0_i32_0 : i32, i32
  }
  func.func @transform_5(%arg0: i32) -> (i32, i32) {
    %c0_i32 = arith.constant 0 : i32
    %c0_i32_0 = arith.constant 0 : i32
    %c0_i32_1 = arith.constant 0 : i32
    return %c0_i32, %c0_i32_0 : i32, i32
  }
  func.func @transform_6(%arg0: i32) -> (i32, i32) {
    %c0_i32 = arith.constant 0 : i32
    %c0_i32_0 = arith.constant 0 : i32
    %c0_i32_1 = arith.constant 0 : i32
    return %c0_i32, %c0_i32_0 : i32, i32
  }
  func.func @transform_7(%arg0: i32) -> (i32, i32) {
    %c0_i32 = arith.constant 0 : i32
    %c0_i32_0 = arith.constant 0 : i32
    return %arg0, %c0_i32 : i32, i32
  }
}

</mosaic_0001>

<bundles_post_ra>
// kernel: tpu_custom_call.1
= control target key start
LH: loop header
LB: loop body
LE: loop exit
PB: predicated region body
PF: predicated region fallthrough
CT: control target
= control target key end

     0   :  { %12 = vsyncpa [#allocation3], 0  ;;  %s728_s0 = inlined_call_operand.hbm [shape: bf16[16,128], index: 0, kind: input, shape index: {}]   ;;  %s729_s1 = inlined_call_operand.hbm [shape: bf16[128,128], index: 1, kind: input, shape index: {}]   ;;  %s730_s2 = inlined_call_operand.vmem [shape: f32[1,128], index: 2, kind: input, shape index: {}]   ;;  %s731_s3 = inlined_call_operand.hbm [shape: bf16[128,128], index: 3, kind: input, shape index: {}]   ;;  %s732_s4 = inlined_call_operand.vmem [shape: f32[1,128], index: 4, kind: input, shape index: {}]   ;;  %s733_s5 = inlined_call_operand.hbm [shape: bf16[128,128], index: 5, kind: input, shape index: {}]   ;;  %s734_s6 = inlined_call_operand.vmem [shape: f32[1,128], index: 6, kind: input, shape index: {}]   ;;  %s735_s7 = inlined_call_operand.hbm [shape: f32[16,128], index: 7, kind: output, shape index: {}]  }
   0x1   :  { %13 = vsyncpa [#allocation6], 0 }
   0x2   :  { %14 = vsyncpa [#allocation9], 0 }
   0x3   :  { %15 = vsyncpa [#allocation4], 0  ;;  %s33_s26 = sshll.u32 %s729_s1, 4  ;;  %s655_s27 = smov [#allocation5]   ;;  %s34_s26 = int_to_ptr.hbm [resolvable:$true] %s33_s26 }
   0x4   :  { %s35_s28 = sshll.u32 %s655_s27, 4  ;;  %s20_s8 = sshll.u32 %s728_s0, 4  ;;  %s36_s28 = int_to_ptr.vmem [resolvable:$true] %s35_s28  ;;  %s21_s8 = int_to_ptr.hbm [resolvable:$true] %s20_s8 }
   0x5   :  { %s656_s9 = smov 64   ;;  %s657_s10 = smov 4  }
   0x6   :  { %41 = dma.hbm_to_vmem [thread:$0]  %s34_s26, 1024, %s36_s28, [#allocation6], %s656_s9, %s656_s9, %s657_s10  }
   0x7   :  { %s658_s11 = smov [#allocation2]   ;;  %s48_s15 = sshll.u32 %s731_s3, 4  ;;  %s49_s15 = int_to_ptr.hbm [resolvable:$true] %s48_s15 }
   0x8   :  { %s22_s12 = sshll.u32 %s658_s11, 4  ;;  %s63_s17 = sshll.u32 %s733_s5, 4  ;;  %s23_s12 = int_to_ptr.vmem [resolvable:$true] %s22_s12  ;;  %s64_s17 = int_to_ptr.hbm [resolvable:$true] %s63_s17 }
   0x9   :  { %28 = dma.hbm_to_vmem [thread:$0]  %s21_s8, 128, %s23_s12, [#allocation3], %s656_s9, %s656_s9, %s657_s10  }
   0xa   :  { %s659_s18 = smov [#allocation7]   ;;  %s660_s0 = smov [#allocation8]  }
   0xb   :  { %s50_s19 = sshll.u32 %s659_s18, 4  ;;  %s65_s20 = sshll.u32 %s660_s0, 4  ;;  %s51_s19 = int_to_ptr.vmem [resolvable:$true] %s50_s19  ;;  %s66_s20 = int_to_ptr.vmem [resolvable:$true] %s65_s20 }
   0xc   :  { %56 = dma.hbm_to_vmem [thread:$0]  %s49_s15, 1024, %s51_s19, [#allocation6], %s656_s9, %s656_s9, %s657_s10  }
   0xd   :  { %71 = dma.hbm_to_vmem [thread:$0]  %s64_s17, 1024, %s66_s20, [#allocation9], %s656_s9, %s656_s9, %s657_s10  }
   0xe   :  { %647 = dma.done.wait [#allocation3], 128  }
   0xf   :  { %648 = vsyncadd [#allocation3], 4294967168 }
  0x10   :  { %649 = dma.done.wait [#allocation6], 2048  }
  0x11   :  { %650 = vsyncadd [#allocation6], 4294965248 }
  0x12   :  { %651 = dma.done.wait [#allocation9], 1024  }
  0x13   :  { %652 = vsyncadd [#allocation9], 4294966272  ;;  %v498_v0 = vld [vmem:[#allocation5 + $0x38] sm:$0xff]  ;;  %v497_v1 = vld [vmem:[#allocation5 + $0x30] sm:$0xff]  ;;  %s661_s23 = smov [#allocation10]   ;;  %s375_s27 = sshll.u32 %s735_s7, 4  ;;  %s376_s27 = int_to_ptr.hbm [resolvable:$true] %s375_s27 }
  0x14   :  { %166 = vmatpush.bf16.msra.mxu0 %v498_v0  ;;  %v506_v2 = vld [vmem:[#allocation7 + $0x38] sm:$0xff]  ;;  %v505_v3 = vld [vmem:[#allocation7 + $0x30] sm:$0xff]  ;;  %v496_v4 = vld [vmem:[#allocation5 + $0x28] sm:$0xff]  ;;  %s373_s24 = sshll.u32 %s661_s23, 4  ;;  %s662_s28 = smov 128   ;;  %s374_s24 = int_to_ptr.vmem [resolvable:$true] %s373_s24 }
  0x15   :  { %251 = vmatpush.bf16.msra.mxu1 %v506_v2  ;;  %268 = vmatpush.bf16.msra.mxu2 %v506_v2  ;;  %v504_v5 = vld [vmem:[#allocation7 + $0x28] sm:$0xff]  ;;  %v495_v6 = vld [vmem:[#allocation5 + $0x20] sm:$0xff]  ;;  %v494_v8 = vld [vmem:[#allocation5 + $0x18] sm:$0xff]  ;;  %s663_s29 = smov 8  }
  0x16   :  { %v503_v7 = vld [vmem:[#allocation7 + $0x20] sm:$0xff]  ;;  %v493_v9 = vld [vmem:[#allocation5 + $0x10] sm:$0xff]  ;;  %v492_v10 = vld [vmem:[#allocation5 + $0x8] sm:$0xff] }
  0x17   :  { %v491_v11 = vld [vmem:[#allocation5] sm:$0xff]  ;;  %v490_v12 = vld [vmem:[#allocation2] sm:$0xff]  ;;  %v501_v14 = vld [vmem:[#allocation7 + $0x10] sm:$0xff] }
  0x18   :  { %167 = vmatpush.bf16.msra.mxu0 %v497_v1  ;;  %v502_v13 = vld [vmem:[#allocation7 + $0x18] sm:$0xff]  ;;  %v500_v15 = vld [vmem:[#allocation7 + $0x8] sm:$0xff]  ;;  %v499_v16 = vld [vmem:[#allocation7] sm:$0xff] }
  0x19   :  { %252 = vmatpush.bf16.msra.mxu1 %v505_v3  ;;  %269 = vmatpush.bf16.msra.mxu2 %v505_v3  ;;  %v524_v18 = vld [vmem:[%s730_s2] ss:$0 sm:$0xff]  ;;  %v513_v26 = vld [vmem:[#allocation8 + $0x30] sm:$0xff]  ;;  %v512_v27 = vld [vmem:[#allocation8 + $0x28] sm:$0xff] }
  0x1a   :  { %v514_v25 = vld [vmem:[#allocation8 + $0x38] sm:$0xff]  ;;  %v511_v28 = vld [vmem:[#allocation8 + $0x20] sm:$0xff]  ;;  %v509_v38 = vld [vmem:[#allocation8 + $0x10] sm:$0xff] }
  0x1b   :  { %353 = vmatpush.bf16.msra.mxu3 %v514_v25  ;;  %v525_v30 = vld [vmem:[%s732_s4] ss:$0 sm:$0xff]  ;;  %v508_v39 = vld [vmem:[#allocation8 + $0x8] sm:$0xff]  ;;  %v507_v40 = vld [vmem:[#allocation8] sm:$0xff] }
  0x1c   :  { %168 = vmatpush.bf16.msra.mxu0 %v496_v4  ;;  %v510_v37 = vld [vmem:[#allocation8 + $0x18] sm:$0xff] }
  0x1d   :  { %253 = vmatpush.bf16.msra.mxu1 %v504_v5  ;;  %270 = vmatpush.bf16.msra.mxu2 %v504_v5  ;;  %v526_v48 = vld [vmem:[%s734_s6] ss:$0 sm:$0xff] }
  0x1f   :  { %354 = vmatpush.bf16.msra.mxu3 %v513_v26 }
  0x20   :  { %169 = vmatpush.bf16.msra.mxu0 %v495_v6 }
  0x21   :  { %254 = vmatpush.bf16.msra.mxu1 %v503_v7  ;;  %271 = vmatpush.bf16.msra.mxu2 %v503_v7 }
  0x23   :  { %355 = vmatpush.bf16.msra.mxu3 %v512_v27 }
  0x24   :  { %170 = vmatpush.bf16.msra.mxu0 %v494_v8 }
  0x25   :  { %255 = vmatpush.bf16.msra.mxu1 %v502_v13  ;;  %272 = vmatpush.bf16.msra.mxu2 %v502_v13 }
  0x27   :  { %356 = vmatpush.bf16.msra.mxu3 %v511_v28 }
  0x28   :  { %171 = vmatpush.bf16.msra.mxu0 %v493_v9 }
  0x29   :  { %256 = vmatpush.bf16.msra.mxu1 %v501_v14  ;;  %273 = vmatpush.bf16.msra.mxu2 %v501_v14 }
  0x2b   :  { %357 = vmatpush.bf16.msra.mxu3 %v510_v37 }
  0x2c   :  { %172 = vmatpush.bf16.msra.mxu0 %v492_v10 }
  0x2d   :  { %257 = vmatpush.bf16.msra.mxu1 %v500_v15  ;;  %274 = vmatpush.bf16.msra.mxu2 %v500_v15 }
  0x2f   :  { %358 = vmatpush.bf16.msra.mxu3 %v509_v38 }
  0x30   :  { %173 = vmatpush.bf16.msra.mxu0 %v491_v11 }
  0x31   :  { %258 = vmatpush.bf16.msra.mxu1 %v499_v16  ;;  %275 = vmatpush.bf16.msra.mxu2 %v499_v16 }
  0x33   :  { %174 = vmatmul.bf16.vlgmr.msra.gmra.mxu0 %v490_v12  ;;  %359 = vmatpush.bf16.msra.mxu3 %v508_v39 }
  0x37   :  { %360 = vmatpush.bf16.msra.mxu3 %v507_v40 }
  0xb0   :  { %v175_v17 = vpop.f32.mrf.mxu0 }
  0xb1   :  { %v176_v19 = vadd.f32 %v524_v18, %v175_v17 }
  0xb3   :  { %v180_v22 = vmax.f32 %v176_v19, 0.0 }
  0xb8   :  { %v177_v20 = vpop.f32.mrf.mxu0 }
  0xb9   :  { %v178_v21 = vadd.f32 %v524_v18, %v177_v20 }
  0xbb   :  { %v181_v23 = vmax.f32 %v178_v21, 0.0 }
  0xbd   :  { %v182_v24 = vpack.c.bf16 %v181_v23, %v180_v22 }
  0xbf   :  { %259 = vmatmul.bf16.vlgmr.msra.gmra.mxu1 %v182_v24 }
 0x13c   :  { %v260_v29 = vpop.f32.mrf.mxu1 }
 0x13d   :  { %v261_v31 = vadd.f32 %v525_v30, %v260_v29 }
 0x13f   :  { %v265_v34 = vmax.f32 %v261_v31, 0.0 }
 0x144   :  { %v262_v32 = vpop.f32.mrf.mxu1 }
 0x145   :  { %v263_v33 = vadd.f32 %v525_v30, %v262_v32 }
 0x147   :  { %v266_v35 = vmax.f32 %v263_v33, 0.0 }
 0x149   :  { %v267_v36 = vpack.c.bf16 %v266_v35, %v265_v34 }
 0x14b   :  { %276 = vmatmul.bf16.vlgmr.msra.gmra.mxu2 %v267_v36 }
 0x1ce   :  { %v277_v41 = vpop.f32.mrf.mxu2 }
 0x1cf   :  { %v278_v42 = vadd.f32 %v525_v30, %v277_v41 }
 0x1d1   :  { %v282_v45 = vmax.f32 %v278_v42, 0.0 }
 0x1d6   :  { %v279_v43 = vpop.f32.mrf.mxu2 }
 0x1d7   :  { %v280_v44 = vadd.f32 %v525_v30, %v279_v43 }
 0x1d9   :  { %v283_v46 = vmax.f32 %v280_v44, 0.0 }
 0x1db   :  { %v284_v47 = vpack.c.bf16 %v283_v46, %v282_v45 }
 0x1dd   :  { %361 = vmatmul.bf16.vlgmr.msra.gmra.mxu3 %v284_v47 }
 0x260   :  { %v362_v49 = vpop.f32.mrf.mxu3 }
 0x261   :  { %v363_v50 = vadd.f32 %v526_v48, %v362_v49 }
 0x263   :  { %367 = vst [vmem:[#allocation10] sm:$0xff] %v363_v50 }
 0x268   :  { %v364_v51 = vpop.f32.mrf.mxu3 }
 0x269   :  { %v365_v52 = vadd.f32 %v526_v48, %v364_v51 }
 0x26b   :  { %368 = vst [vmem:[#allocation10 + $0x8] sm:$0xff] %v365_v52 }
 0x26c   :  { %381 = dma.vmem_to_hbm [thread:$0]  %s374_s24, 256, %s376_s27, [#allocation4], %s662_s28, %s662_s28, %s663_s29  }
 0x26d   :  { %653 = dma.done.wait [#allocation4], 256  }
 0x26e   :  { %654 = vsyncadd [#allocation4], 4294967040 }
 0x26f   :  { %386 = vsyncpa [#allocation3], 1 }
 0x270   :  { %387 = vsyncpa [#allocation6], 1 }
 0x271   :  { %388 = vsyncpa [#allocation9], 1 }
 0x272   :  { %389 = vsyncpa [#allocation4], 1 }

</bundles_post_ra>
